<compile_context>
chip_gen: v6e
topology: v6e:2x2x1
jax: 0.10.0
libtpu: 0.0.40
codegen_flags: <defaults>
</compile_context>

<pallas_src>
import functools

import jax
import jax.numpy as jnp
from jax.experimental import pallas as pl
from jax.experimental.pallas import tpu as pltpu


# ---------------------------------------------------------------------------
# Fused single-pass kernel: pool -> MLP -> sigmoid -> scale on a resident
# per-batch (C, HW) slab.  x is read once, out written once.
# ---------------------------------------------------------------------------
def _se_fused_kernel(x_ref, w1_ref, w2_ref, o_ref, *, inv_hw):
    # x_ref: (1, C, HW)  current batch slab
    # w1_ref: (Hid, C)   fc1.weight (resident, constant index_map)
    # w2_ref: (C, Hid)   fc2.weight (resident, constant index_map)
    # o_ref: (1, C, HW)
    x = x_ref[0]                                                    # (C, HW)

    # Channel means: f32-accumulated cross-lane reduce, kept column-oriented
    # (C on sublanes) so no transposes are needed anywhere.
    pooled = jnp.sum(x.astype(jnp.float32), axis=-1,
                     keepdims=True) * inv_hw                        # (C, 1)

    w1 = w1_ref[...].astype(jnp.float32)                            # (Hid, C)
    w2 = w2_ref[...].astype(jnp.float32)                            # (C, Hid)
    hid = jnp.maximum(
        jnp.dot(w1, pooled, preferred_element_type=jnp.float32), 0.0)   # (Hid, 1)
    gate = jax.nn.sigmoid(
        jnp.dot(w2, hid, preferred_element_type=jnp.float32))           # (C, 1)

    # Scale in the input dtype (bf16-native VPU on v6e/v7x; no full-tile
    # f32 upcast of x for the multiply).
    o_ref[...] = (x * gate.astype(x.dtype)).astype(o_ref.dtype)[None]


# ---------------------------------------------------------------------------
# Two-pass fallback (per-batch slab too large for VMEM): C-tiled pool kernel,
# tiny MLP hoisted to plain JAX, C-tiled elementwise scale kernel.
# ---------------------------------------------------------------------------
def _se_pool_kernel(x_ref, pooled_ref):
    # x_ref: (1, tC, HW); pooled_ref: (1, tC, 1) f32 channel sums.
    pooled_ref[...] = jnp.sum(x_ref[...].astype(jnp.float32), axis=-1,
                              keepdims=True)


def _se_scale_kernel(x_ref, gate_ref, o_ref):
    # x_ref/o_ref: (1, tC, HW); gate_ref: (1, tC, 1) already in x.dtype.
    o_ref[...] = (x_ref[...] * gate_ref[...]).astype(o_ref.dtype)


def _pick_c_tile(c, hw, itemsize, target_bytes):
    """Largest multiple of 8 that divides C and keeps a (tC, HW) tile within
    target_bytes (falls back to 8, or to C when C isn't a multiple of 8)."""
    if c % 8 != 0:
        return c
    best = 8
    t = 8
    while t <= c:
        if c % t == 0 and t * hw * itemsize <= target_bytes:
            best = t
        t += 8
    return best


def se1_block_forward(x, w1, w2, *,
                      fused_vmem_budget_bytes=24 << 20,
                      tile_target_bytes=4 << 20):
    """SE block forward.

    x:  (B, C, H, W)
    w1: (Hid, C)  fc1 weight  (nn.Linear(C, C//ratio, bias=False))
    w2: (C, Hid)  fc2 weight  (nn.Linear(C//ratio, C, bias=False))
    Returns x * gate, shape (B, C, H, W).
    """
    B, C, H, W = x.shape
    Hid = w1.shape[0]
    HW = H * W
    inv_hw = 1.0 / float(HW)
    itemsize = jnp.dtype(x.dtype).itemsize

    x3 = x.reshape(B, C, HW)            # no padding: full HW is the last dim
    slab_bytes = C * HW * itemsize
    w_bytes = (w1.size + w2.size) * jnp.dtype(w1.dtype).itemsize

    # ---------------- fused single-pass path ----------------
    if 4 * slab_bytes + w_bytes <= fused_vmem_budget_bytes:
        # 4x slab = double-buffered in + out; +2x for a possible f32 reduce
        # copy; headroom for compiler scratch.  Capped under v7x physical VMEM.
        vmem_limit = min(56 << 20,
                         max(32 << 20, 6 * slab_bytes + w_bytes + (4 << 20)))
        # TODO(synk): for B==1 on v7x, add a size-2 "parallel" HW-split axis so
        # both TensorCores contribute bandwidth.
        out3 = pl.pallas_call(
            functools.partial(_se_fused_kernel, inv_hw=inv_hw),
            out_shape=jax.ShapeDtypeStruct((B, C, HW), x.dtype),
            grid=(B,),
            in_specs=[
                pl.BlockSpec((1, C, HW), lambda b: (b, 0, 0)),
                pl.BlockSpec((Hid, C), lambda b: (0, 0)),
                pl.BlockSpec((C, Hid), lambda b: (0, 0)),
            ],
            out_specs=pl.BlockSpec((1, C, HW), lambda b: (b, 0, 0)),
            compiler_params=pltpu.CompilerParams(
                dimension_semantics=("parallel",),
                vmem_limit_bytes=vmem_limit),
            cost_estimate=pl.CostEstimate(
                flops=3 * B * C * HW + 4 * B * C * Hid,
                transcendentals=B * C,
                bytes_accessed=2 * B * C * HW * itemsize + w_bytes),
        )(x3, w1, w2)
        return out3.reshape(B, C, H, W)

    # ---------------- two-pass fallback ----------------
    tC = _pick_c_tile(C, HW, itemsize, tile_target_bytes)
    n_c = C // tC
    block_bytes = tC * HW * itemsize
    vmem_limit = min(56 << 20, max(32 << 20, 6 * block_bytes + (4 << 20)))

    pooled = pl.pallas_call(
        _se_pool_kernel,
        out_shape=jax.ShapeDtypeStruct((B, C, 1), jnp.float32),
        grid=(B, n_c),
        in_specs=[pl.BlockSpec((1, tC, HW), lambda b, c: (b, c, 0))],
        out_specs=pl.BlockSpec((1, tC, 1), lambda b, c: (b, c, 0)),
        compiler_params=pltpu.CompilerParams(
            dimension_semantics=("parallel", "parallel"),
            vmem_limit_bytes=vmem_limit),
        cost_estimate=pl.CostEstimate(
            flops=B * C * HW,
            transcendentals=0,
            bytes_accessed=B * C * HW * itemsize),
    )(x3)

    # Tiny per-batch MLP + sigmoid hoisted to plain JAX (negligible FLOPs).
    mean = pooled[:, :, 0] * inv_hw                                   # (B, C)
    hid = jnp.maximum(mean @ w1.T.astype(jnp.float32), 0.0)          # (B, Hid)
    gate = jax.nn.sigmoid(hid @ w2.T.astype(jnp.float32))            # (B, C)
    gate3 = gate.astype(x.dtype)[:, :, None]                         # (B, C, 1)

    out3 = pl.pallas_call(
        _se_scale_kernel,
        out_shape=jax.ShapeDtypeStruct((B, C, HW), x.dtype),
        grid=(B, n_c),
        in_specs=[
            pl.BlockSpec((1, tC, HW), lambda b, c: (b, c, 0)),
            pl.BlockSpec((1, tC, 1), lambda b, c: (b, c, 0)),
        ],
        out_specs=pl.BlockSpec((1, tC, HW), lambda b, c: (b, c, 0)),
        compiler_params=pltpu.CompilerParams(
            dimension_semantics=("parallel", "parallel"),
            vmem_limit_bytes=vmem_limit),
        cost_estimate=pl.CostEstimate(
            flops=B * C * HW,
            transcendentals=0,
            bytes_accessed=2 * B * C * HW * itemsize),
    )(x3, gate3)
    return out3.reshape(B, C, H, W)


def se1_block_ref(x, w1, w2):
    """Plain-JAX reference mirroring the PyTorch forward."""
    y = jnp.mean(x, axis=(2, 3))                 # (B, C)  AdaptiveAvgPool2d(1)
    y = jnp.maximum(y @ w1.T, 0.0)               # fc1 + ReLU
    y = jax.nn.sigmoid(y @ w2.T)                 # fc2 + Sigmoid
    return x * y[:, :, None, None]


if __name__ == "__main__":
    # ratio=16 -> channel must be >=16.  HW = 14*14 = 196 deliberately not a
    # multiple of 128 to exercise the no-padding (full-HW block) path.
    B, C, H, W = 2, 64, 14, 14
    ratio = 16
    Hid = C // ratio  # 4

    key = jax.random.PRNGKey(0)
    kx, k1, k2 = jax.random.split(key, 3)

    x = jax.random.normal(kx, (B, C, H, W), dtype=jnp.float32)
    # Deterministic kaiming-uniform-like init (Linear default scale), bias=False.
    bound1 = 1.0 / (C ** 0.5)
    bound2 = 1.0 / (Hid ** 0.5)
    w1 = jax.random.uniform(k1, (Hid, C), minval=-bound1, maxval=bound1,
                            dtype=jnp.float32)   # fc1.weight
    w2 = jax.random.uniform(k2, (C, Hid), minval=-bound2, maxval=bound2,
                            dtype=jnp.float32)   # fc2.weight

    ref = se1_block_ref(x, w1, w2)

    # Fused single-pass path (per-batch slab resident in VMEM).
    out = jax.block_until_ready(se1_block_forward(x, w1, w2))
    assert out.shape == (B, C, H, W)
    assert jnp.allclose(out, ref, atol=1e-5, rtol=1e-5)

    # Forced two-pass fallback (C tiled into 4 chunks, HW kept whole).
    out2 = jax.block_until_ready(
        se1_block_forward(x, w1, w2,
                          fused_vmem_budget_bytes=0,
                          tile_target_bytes=16 << 10))
    assert jnp.allclose(out2, ref, atol=1e-5, rtol=1e-5)

    print("KERNEL_OK")
</pallas_src>

<mosaic_0001>
module attributes {stable_mosaic.version = 11 : i64} {
  func.func @_se_fused_kernel(%arg0: i32, %arg1: memref<1x64x196xf32, #tpu.memory_space<vmem>>, %arg2: memref<4x64xf32, #tpu.memory_space<vmem>>, %arg3: memref<64x4xf32, #tpu.memory_space<vmem>>, %arg4: memref<1x64x196xf32, #tpu.memory_space<vmem>>) attributes {dimension_semantics = [#tpu.dimension_semantics<parallel>], iteration_bounds = array<i64: 2>, scalar_prefetch = 0 : i64, scratch_operands = 0 : i64, tpu.core_type = #tpu.core_type<tc>, window_params = [{transform_indices = @transform_0, window_bounds = array<i64: 1, 64, 196>}, {pipeline_mode = #tpu.pipeline_mode<synchronous>, transform_indices = @transform_1, window_bounds = array<i64: 4, 64>}, {pipeline_mode = #tpu.pipeline_mode<synchronous>, transform_indices = @transform_2, window_bounds = array<i64: 64, 4>}, {transform_indices = @transform_3, window_bounds = array<i64: 1, 64, 196>}]} {
    %c0 = arith.constant 0 : index
    %c0_0 = arith.constant 0 : index
    %c0_1 = arith.constant 0 : index
    %0 = vector.load %arg1[%c0, %c0_0, %c0_1] : memref<1x64x196xf32, #tpu.memory_space<vmem>>, vector<1x64x196xf32>
    %1 = vector.shape_cast %0 : vector<1x64x196xf32> to vector<64x196xf32>
    %cst = arith.constant dense<0.000000e+00> : vector<64xf32>
    %2 = vector.multi_reduction <add>, %1, %cst [1] : vector<64x196xf32> to vector<64xf32>
    %3 = vector.shape_cast %2 : vector<64xf32> to vector<64x1xf32>
    %cst_2 = arith.constant 0.00510204071 : f32
    %4 = vector.broadcast %cst_2 : f32 to vector<64x1xf32>
    %5 = arith.mulf %3, %4 : vector<64x1xf32>
    %c0_3 = arith.constant 0 : index
    %c0_4 = arith.constant 0 : index
    %6 = vector.load %arg2[%c0_3, %c0_4] : memref<4x64xf32, #tpu.memory_space<vmem>>, vector<4x64xf32>
    %c0_5 = arith.constant 0 : index
    %c0_6 = arith.constant 0 : index
    %7 = vector.load %arg3[%c0_5, %c0_6] : memref<64x4xf32, #tpu.memory_space<vmem>>, vector<64x4xf32>
    %cst_7 = arith.constant dense<0.000000e+00> : vector<4x1xf32>
    %8 = tpu.matmul %6, %5, %cst_7 {dimension_numbers = #tpu.dot_dimension_numbers<[1], [0], [0], [1], [0, 0, 1, 1], [], []>} : vector<4x64xf32>, vector<64x1xf32>, vector<4x1xf32> -> vector<4x1xf32>
    %cst_8 = arith.constant 0.000000e+00 : f32
    %9 = vector.broadcast %cst_8 : f32 to vector<4x1xf32>
    %10 = arith.maximumf %8, %9 : vector<4x1xf32>
    %cst_9 = arith.constant dense<0.000000e+00> : vector<64x1xf32>
    %11 = tpu.matmul %7, %10, %cst_9 {dimension_numbers = #tpu.dot_dimension_numbers<[1], [0], [0], [1], [0, 0, 1, 1], [], []>} : vector<64x4xf32>, vector<4x1xf32>, vector<64x1xf32> -> vector<64x1xf32>
    %12 = arith.negf %11 : vector<64x1xf32>
    %13 = math.exp %12 : vector<64x1xf32>
    %cst_10 = arith.constant 1.000000e+00 : f32
    %14 = vector.broadcast %cst_10 : f32 to vector<64x1xf32>
    %15 = arith.addf %14, %13 : vector<64x1xf32>
    %16 = arith.divf %14, %15 : vector<64x1xf32>
    %17 = vector.broadcast %16 : vector<64x1xf32> to vector<64x196xf32>
    %18 = arith.mulf %1, %17 : vector<64x196xf32>
    %19 = vector.shape_cast %18 : vector<64x196xf32> to vector<1x64x196xf32>
    %c0_11 = arith.constant 0 : index
    %c0_12 = arith.constant 0 : index
    %c0_13 = arith.constant 0 : index
    %20 = vector.load %arg4[%c0_11, %c0_12, %c0_13] : memref<1x64x196xf32, #tpu.memory_space<vmem>>, vector<1x64x196xf32>
    tpu.vector_store %arg4[%c0_11, %c0_12, %c0_13], %19 {strides = array<i32>} : memref<1x64x196xf32, #tpu.memory_space<vmem>>, vector<1x64x196xf32>,
    return
  }
  func.func @transform_0(%arg0: i32) -> (i32, i32, i32) {
    %c0_i32 = arith.constant 0 : i32
    %c0_i32_0 = arith.constant 0 : i32
    %c0_i32_1 = arith.constant 0 : i32
    return %arg0, %c0_i32, %c0_i32_0 : i32, i32, i32
  }
  func.func @transform_1(%arg0: i32) -> (i32, i32) {
    %c0_i32 = arith.constant 0 : i32
    %c0_i32_0 = arith.constant 0 : i32
    %c0_i32_1 = arith.constant 0 : i32
    return %c0_i32, %c0_i32_0 : i32, i32
  }
  func.func @transform_2(%arg0: i32) -> (i32, i32) {
    %c0_i32 = arith.constant 0 : i32
    %c0_i32_0 = arith.constant 0 : i32
    %c0_i32_1 = arith.constant 0 : i32
    return %c0_i32, %c0_i32_0 : i32, i32
  }
  func.func @transform_3(%arg0: i32) -> (i32, i32, i32) {
    %c0_i32 = arith.constant 0 : i32
    %c0_i32_0 = arith.constant 0 : i32
    %c0_i32_1 = arith.constant 0 : i32
    return %arg0, %c0_i32, %c0_i32_0 : i32, i32, i32
  }
}

</mosaic_0001>

<bundles_post_ra>
// kernel: tpu_custom_call.1
= control target key start
LH: loop header
LB: loop body
LE: loop exit
PB: predicated region body
PF: predicated region fallthrough
CT: control target
= control target key end

     0   :  { %8 = vsyncpa [#allocation3], 0  ;;  %s1276_s0 = inlined_call_operand.hbm [shape: f32[2,64,196], index: 0, kind: input, shape index: {}]   ;;  %s1277_s1 = inlined_call_operand.vmem [shape: f32[4,64], index: 1, kind: input, shape index: {}]   ;;  %s1278_s2 = inlined_call_operand.vmem [shape: f32[64,4], index: 2, kind: input, shape index: {}]   ;;  %s1279_s3 = inlined_call_operand.hbm [shape: f32[2,64,196], index: 3, kind: output, shape index: {}]  }
   0x1   :  { %10 = vsyncpa [#allocation3 + $0x1], 0 }
   0x2   :  { %11 = vsyncpa [#allocation4], 0 }
   0x3   :  { %13 = vsyncpa [#allocation4 + $0x1], 0  ;;  %s966_s12 = smov 0   ;;  %s968_s13 = smov 0  }
   0x4   :  { %s970_s14 = smov 0   ;;  %s972_s15 = smov 0  }
   0x5 LB: > { %s987_s16 = sadd.s32 4294967295, %s935_s15   ;;  %s671_s17 = sadd.s32 4294967294, %s935_s15   ;;  %s935_s15 = sphi %s972_s15, %s1294_s15   ;;  %s931_s14 = sphi %s970_s14, %s1293_s14   ;;  %s927_s13 = sphi %s968_s13, %s1292_s13   ;;  %s923_s12 = sphi %s966_s12, %s1291_s12  }
   0x6   : > { %s991_s18 = sadd.s32 1, %s935_s15   ;;  %s26_s19 = sadd.s32 1, %s931_s14 }
   0x7   : > { %s23_s20 = ssub.s32 %s935_s15, %s991_s18  ;;  %p33_p0 = scmp.ne.s32.totalorder %s931_s14, %s927_s13 }
   0x8   : > { %p24_p1 = scmp.eq.s32.totalorder %s23_s20, 0  ;;  %p34_p2 = scmp.eq.s32.totalorder %s935_s15, 0 }
   0x9   : > { %p39_p3 = scmp.ne.s32.totalorder %s927_s13, %s923_s12  ;;  %p40_p4 = scmp.eq.s32.totalorder %s987_s16, 0 }
   0xa   : > { %s1003_s21 = scalar_select %p24_p1, %s931_s14, %s26_s19  }
   0xb   : > { %p1005_p5 = por %p34_p2, %p33_p0  ;;  %p1009_p6 = por %p40_p4, %p39_p3 }
   0xc   : > { %p105_p7 = scmp.eq.s32.totalorder %s987_s16, 1  ;;  %p111_p8 = scmp.eq.s32.totalorder %s671_s17, 1 }
   0xd   : > { %s1283_s23 = scalar_select %p1009_p6, 1, 0 }
   0xe   : > { %p768_p10 = scmp.lt.s32.totalorder %s935_s15, 2  ;;  %p1016_p11 = por %p105_p7, %p33_p0 }
   0xf   : > { %p1020_p12 = por %p111_p8, %p39_p3  ;;  %s137_s26 = sand.u32 1, %s931_s14  }
  0x10   : > { %s1284_s24 = scalar_select %p1016_p11, 1, 0 }
  0x11   : > { %s1285_s25 = scalar_select %p1020_p12, 1, 0 }
  0x12   : > { %s703_s27 = sshll.u32 %s935_s15, 11  ;;  %s674_s28 = sshll.u32 %s137_s26, 7 }
  0x13   : > { %s1029_s4 = scalar_lea.hbm %s1276_s0, %s703_s27  ;;  %s141_s5 = scalar_lea.vmem [#allocation2], %s674_s28 }
  0x14   : > { %s148_s6 = sshll.u32 %s141_s5, 4  ;;  %p1033_p13 = pnand %p768_p10, %p1005_p5  ;;  %s1037_s6 = int_to_ptr.vmem [resolvable:$true] %s148_s6 }
  0x15   : > { %s1039_s8 = scalar_lea.sflag [#allocation3], %s137_s26  ;;  %s843_s9 = scalar_lea.hbm %s1029_s4, 2048 }
  0x16   : > { %p844_p0 = scmp.ne.s32.totalorder %s1029_s4, %s843_s9  ;;  %p845_p1 = pneg %p1033_p13 }
  0x17   : > { %s848_s17 = scalar_lea.hbm %s1276_s0, 4096  ;;  %p849_p4 = scmp.lt.s32.totalorder %s1029_s4, %s1276_s0 }
  0x18   : > { %p846_p2 = pnand %p845_p1, %p844_p0  ;;  %p850_p5 = scmp.lt.s32.totalorder %s848_s17, %s843_s9 }
  0x1a   : > { %p847_p3 = pneg %p846_p2  ;;  %p851_p7 = por %p850_p5, %p849_p4 }
  0x1c   : > { %p852_p8 = pnand %p851_p7, %p847_p3 }
  0x1e   : > { %855 = shalt.err (!%p852_p8)
}
  0x1f   : > { %s856_s22 = scalar_lea.vmem %s1037_s6, 2048  ;;  %s937_s26 = smov [#allocation2]  }
  0x20   : > { %p857_p10 = scmp.ne.s32.totalorder %s1037_s6, %s856_s22  ;;  %s861_s27 = sshll.u32 %s937_s26, 4  ;;  %s862_s27 = int_to_ptr.vmem [resolvable:$false] %s861_s27 }
  0x21   : > { %s863_s28 = scalar_lea.vmem %s862_s27, 4096  ;;  %p864_p2 = scmp.lt.s32.totalorder %s1037_s6, %s862_s27 }
  0x22   : > { %p859_p9 = pnand %p857_p10, %p845_p1  ;;  %p865_p12 = scmp.lt.s32.totalorder %s863_s28, %s856_s22 }
  0x24   : > { %p860_p0 = pneg %p859_p9  ;;  %p866_p11 = por %p865_p12, %p864_p2 }
  0x26   : > { %p867_p6 = pnand %p866_p11, %p860_p0 }
  0x28   : > { %870 = shalt.err (!%p867_p6)
}
  0x29   : > { %s938_s29 = smov 256   ;;  %s939_s30 = smov 16  }
  0x2a   : > { %763 = dma.hbm_to_vmem [thread:$0]  (!%p1033_p13), %s1029_s4, 2048, %s1037_s6, %s1039_s8, %s938_s29, %s938_s29, %s939_s30  }
  0x2b   : > { %p677_p9 = scmp.ge.s32.totalorder %s935_s15, 1  ;;  %p156_p1 = scmp.lt.s32.totalorder %s935_s15, 3 }
  0x2d   : > { %p157_p3 = pnand %p677_p9, %p156_p1 }
  0x2e   : > { %s1063_s5 = sand.u32 (!%p157_p3), 1, %s927_s13   ;;  %p1287_p6 = scmp.ne.s32.totalorder (!%p157_p3), %s1283_s23, 0 }
  0x2f   : > { %160 = sbr.rel (%p157_p3) target bundleno = 800 (0x320), region = 32  ;;  %s678_s9 = sshll.u32 (!%p157_p3), %s1063_s5, 7 }
  0x30   : > { %s163_s10 = scalar_lea.sflag (!%p157_p3), [#allocation3], %s1063_s5  ;;  %s1069_s11 = scalar_lea.vmem (!%p157_p3), [#allocation2], %s678_s9 }
  0x34   : > { %914 = dma.done.wait (%p1287_p6), %s163_s10, 2048  }
  0x35   : > { %916 = vsyncadd (%p1287_p6), %s163_s10, 4294965248  ;;  %vm205_vm0 = vcmask 556032   ;;  %v1076_v0 = vld [vmem:[%s1069_s11 + $0x70] sm:$0xff]  ;;  %v1079_v1 = vld [vmem:[%s1069_s11 + $0x78] sm:$0xff]  ;;  %v940_v32 = vmov 0.0   ;;  %vm941_vm1 = vmmov 0  }
  0x36   : > { %v1082_v2 = vld [vmem:[%s1069_s11 + $0x60] sm:$0xff]  ;;  %v234_v3 = vsel %vm205_vm0, %v1079_v1, 0.0  ;;  %v1087_v4 = vld [vmem:[%s1069_s11 + $0x68] sm:$0xff]  ;;  %v1090_v5 = vld [vmem:[%s1069_s11 + $0x50] sm:$0xff]  ;;  %723 = vmatprep.subr.mxu0 %v940_v32  ;;  %739 = vmatprep.mubr.msk.f32.mxu0 %vm941_vm1, %v940_v32  ;;  %vm255_vm2 = vcmask 523264   ;;  %vm330_vm3 = vcmask 31744  }
  0x37   : > { %v1093_v6 = vld [vmem:[%s1069_s11 + $0x58] sm:$0xff]  ;;  %v235_v7 = vadd.f32 %v234_v3, %v1076_v0  ;;  %v230_v8 = vsel %vm205_vm0, %v1087_v4, 0.0  ;;  %v1101_v10 = vld [vmem:[%s1069_s11 + $0x40] sm:$0xff]  ;;  %v1104_v11 = vld [vmem:[%s1069_s11 + $0x48] sm:$0xff]  ;;  %vm355_vm4 = vcmask 1043456   ;;  %v942_v61 = vmov 0  }
  0x38   : > { %v226_v9 = vsel %vm205_vm0, %v1093_v6, 0.0  ;;  %v222_v13 = vsel %vm205_vm0, %v1104_v11, 0.0  ;;  %v1110_v14 = vld [vmem:[%s1069_s11 + $0x38] sm:$0xff]  ;;  %v1113_v15 = vld [vmem:[%s1069_s11 + $0x28] sm:$0xff]  ;;  %v231_v16 = vadd.f32 %v230_v8, %v1082_v2  ;;  %v1118_v18 = vld [vmem:[%s1069_s11 + $0x30] sm:$0xff]  ;;  %810 = vset.pattern.permute.xlu1 %v942_v61  ;;  %809 = vset.pattern.permute.xlu0 %v942_v61  ;;  %s1186_s6 = scalar_lea.vmem [#allocation5], %s678_s9 }
  0x39   : > { %v227_v12 = vadd.f32 %v226_v9, %v1090_v5  ;;  %236 = vadd.xlane.f32.xlu0 %v235_v7  ;;  %v223_v17 = vadd.f32 %v222_v13, %v1101_v10  ;;  %v218_v19 = vsel %vm205_vm0, %v1110_v14, 0.0  ;;  %v1123_v20 = vld [vmem:[%s1069_s11 + $0x20] sm:$0xff]  ;;  %v214_v21 = vsel %vm205_vm0, %v1113_v15, 0.0  ;;  %v1128_v22 = vld [vmem:[%s1069_s11 + $0x18] sm:$0xff]  ;;  %v1131_v23 = vld [vmem:[%s1069_s11 + $0x8] sm:$0xff]  ;;  %s704_s9 = sshll.u32 %s987_s16, 11 }
  0x3a   : > { %v219_v24 = vadd.f32 %v218_v19, %v1118_v18  ;;  %v215_v25 = vadd.f32 %v214_v21, %v1123_v20  ;;  %v1136_v26 = vld [vmem:[%s1069_s11 + $0x10] sm:$0xff]  ;;  %v210_v27 = vsel %vm205_vm0, %v1128_v22, 0.0  ;;  %v1141_v28 = vld [vmem:[%s1069_s11] sm:$0xff]  ;;  %v206_v29 = vsel %vm205_vm0, %v1131_v23, 0.0  ;;  %v248_v54 = vld [vmem:[%s1278_s2 + $0x8] sm:$0xff]  ;;  %s598_s7 = sshll.u32 %s1186_s6, 4  ;;  %s1226_s19 = scalar_lea.hbm %s1279_s3, %s704_s9  ;;  %s1228_s7 = int_to_ptr.vmem [resolvable:$true] %s598_s7 }
  0x3b   : > { %228 = vadd.xlane.f32.xlu1 %v227_v12  ;;  %v211_v30 = vadd.f32 %v210_v27, %v1136_v26  ;;  %v207_v31 = vadd.f32 %v206_v29, %v1141_v28  ;;  %v246_v49 = vld [vmem:[%s1277_s1] sm:$0xf]  ;;  %v249_v55 = vld [vmem:[%s1278_s2 + $0x10] sm:$0xff]  ;;  %v250_v56 = vld [vmem:[%s1278_s2 + $0x18] sm:$0xff]  ;;  %s585_s16 = scalar_lea.sflag [#allocation4], %s1063_s5  ;;  %s871_s20 = scalar_lea.vmem %s1228_s7, 2048 }
  0x3c   : > { %v247_v50 = vld [vmem:[%s1278_s2] sm:$0xff]  ;;  %v252_v58 = vld [vmem:[%s1278_s2 + $0x28] sm:$0xff]  ;;  %v253_v59 = vld [vmem:[%s1278_s2 + $0x30] sm:$0xff]  ;;  %p872_p11 = scmp.ne.s32.totalorder %s1228_s7, %s871_s20  ;;  %p1288_p12 = scmp.ne.s32.totalorder %s1284_s24, 0 }
  0x3d   : > { %232 = vadd.xlane.f32.xlu0 %v231_v16  ;;  %744 = vmatprep.mubr.msk.f32.mxu1 %vm330_vm3, %v247_v50  ;;  %v251_v57 = vld [vmem:[%s1278_s2 + $0x20] sm:$0xff]  ;;  %v254_v60 = vld [vmem:[%s1278_s2 + $0x38] sm:$0xff]  ;;  %s943_s22 = smov [#allocation5]  }
  0x3e   : > { %p873_p13 = pnand %p872_p11, %p1288_p12  ;;  %s875_s26 = sshll.u32 %s943_s22, 4  ;;  %s876_s26 = int_to_ptr.vmem [resolvable:$false] %s875_s26 }
  0x3f   : > { %224 = vadd.xlane.f32.xlu1 %v223_v17  ;;  %s877_s27 = scalar_lea.vmem %s876_s26, 4096  ;;  %p878_p5 = scmp.lt.s32.totalorder %s1228_s7, %s876_s26 }
  0x40   : > { %p874_p4 = pneg %p873_p13  ;;  %p879_p7 = scmp.lt.s32.totalorder %s877_s27, %s871_s20 }
  0x41   : > { %220 = vadd.xlane.f32.xlu0 %v219_v24 }
  0x42   : > { %p880_p8 = por %p879_p7, %p878_p5 }
  0x43   : > { %216 = vadd.xlane.f32.xlu1 %v215_v25 }
  0x44   : > { %p881_p10 = pnand %p880_p8, %p874_p4 }
  0x45   : > { %212 = vadd.xlane.f32.xlu0 %v211_v30 }
  0x47   : > { %208 = vadd.xlane.f32.xlu1 %v207_v31 }
  0xc2   : > { %v237_v33 = vpop.xlane.xlu0 %236 }
  0xc3   : > { %v245_v34 = vmul.f32 0.0051020407, %v237_v33 }
  0xc4   : > { %v229_v35 = vpop.xlane.xlu1 %228 }
  0xc5   : > { %724 = vmatpush3.msra.mxu0 %v245_v34  ;;  %v243_v39 = vmul.f32 0.0051020407, %v229_v35 }
  0xc6   : > { %v233_v36 = vpop.xlane.xlu0 %232  ;;  %725 = vmatprep.subr.mxu0 %v940_v32 }
  0xc7   : > { %v244_v37 = vmul.f32 0.0051020407, %v233_v36 }
  0xc8   : > { %v225_v38 = vpop.xlane.xlu1 %224 }
  0xc9   : > { %726 = vmatpush3.msra.mxu0 %v244_v37  ;;  %v242_v40 = vmul.f32 0.0051020407, %v225_v38 }
  0xca   : > { %727 = vmatprep.subr.mxu0 %v940_v32  ;;  %v221_v41 = vpop.xlane.xlu0 %220 }
  0xcb   : > { %728 = vmatpush3.msra.mxu0 %v243_v39  ;;  %v241_v42 = vmul.f32 0.0051020407, %v221_v41 }
  0xcc   : > { %v217_v43 = vpop.xlane.xlu1 %216  ;;  %729 = vmatprep.subr.mxu0 %v940_v32 }
  0xcd   : > { %730 = vmatpush3.msra.mxu0 %v242_v40  ;;  %v240_v44 = vmul.f32 0.0051020407, %v217_v43 }
  0xce   : > { %731 = vmatprep.subr.mxu0 %v940_v32  ;;  %v213_v45 = vpop.xlane.xlu0 %212 }
  0xcf   : > { %732 = vmatpush3.msra.mxu0 %v241_v42  ;;  %v239_v46 = vmul.f32 0.0051020407, %v213_v45 }
  0xd0   : > { %v209_v47 = vpop.xlane.xlu1 %208  ;;  %733 = vmatprep.subr.mxu0 %v940_v32 }
  0xd1   : > { %734 = vmatpush3.msra.mxu0 %v240_v44  ;;  %v238_v48 = vmul.f32 0.0051020407, %v209_v47 }
  0xd2   : > { %735 = vmatprep.subr.mxu0 %v940_v32 }
  0xd3   : > { %736 = vmatpush3.msra.mxu0 %v239_v46 }
  0xd4   : > { %737 = vmatprep.subr.mxu0 %v940_v32 }
  0xd5   : > { %738 = vmatpush3.msra.mxu0 %v238_v48 }
  0xd6   : > { %740 = vmatmul.mubr.msk.f32.vlgmr.msra.gmra.mxu0 %vm255_vm2, %v246_v49 }
 0x196   : > { %v325_v51 = vpop.f32.mrf.mxu0 }
 0x197   : > { %v329_v52 = vmax.f32 %v325_v51, 0.0 }
 0x198   : > { %v741_v53 = vpop.f32.mrf.mxu0 }
 0x199   : > { %742 = vmatprep.subr.msk.mxu1 %vm355_vm4, %v329_v52 }
 0x19a   : > { %743 = vmatpush3.msk.msra.mxu1 %vm355_vm4, %v329_v52 }
 0x19b   : > { %745 = vmatmul.mubr.msk.f32.vlgmr.msra.gmra.mxu1 %vm330_vm3, %v248_v54 }
 0x19c   : > { %747 = vmatprep.mubr.msk.f32.mxu1 %vm330_vm3, %v249_v55 }
 0x19f   : > { %748 = vmatmul.mubr.msk.f32.gmra.mxu1 %vm330_vm3, %v250_v56 }
 0x1a0   : > { %750 = vmatprep.mubr.msk.f32.mxu1 %vm330_vm3, %v251_v57 }
 0x1a3   : > { %751 = vmatmul.mubr.msk.f32.gmra.mxu1 %vm330_vm3, %v252_v58 }
 0x1a4   : > { %753 = vmatprep.mubr.msk.f32.mxu1 %vm330_vm3, %v253_v59 }
 0x1a7   : > { %754 = vmatmul.mubr.msk.f32.gmra.mxu1 %vm330_vm3, %v254_v60 }
 0x25b   : > { %v746_v62 = vpop.f32.mrf.mxu1 }
 0x25c   : > { %v691_v63 = vmul.f32 -1.442695, %v746_v62 }
 0x25d   : > { %v425_v3 = vpop.f32.mrf.mxu1 }
 0x25e   : > { %811 = vpow2.f32 %v691_v63  ;;  %v690_v7 = vmul.f32 -1.442695, %v425_v3 }
 0x25f   : > { %v749_v8 = vpop.f32.mrf.mxu1 }
 0x260   : > { %813 = vpow2.f32 %v690_v7  ;;  %v693_v9 = vmul.f32 -1.442695, %v749_v8 }
 0x261   : > { %v435_v12 = vpop.f32.mrf.mxu1 }
 0x262   : > { %815 = vpow2.f32 %v693_v9  ;;  %v692_v13 = vmul.f32 -1.442695, %v435_v12 }
 0x263   : > { %v752_v16 = vpop.f32.mrf.mxu1 }
 0x264   : > { %817 = vpow2.f32 %v692_v13  ;;  %v695_v17 = vmul.f32 -1.442695, %v752_v16 }
 0x265   : > { %v445_v19 = vpop.f32.mrf.mxu1 }
 0x266   : > { %819 = vpow2.f32 %v695_v17  ;;  %v694_v21 = vmul.f32 -1.442695, %v445_v19 }
 0x267   : > { %v755_v24 = vpop.f32.mrf.mxu1 }
 0x268   : > { %821 = vpow2.f32 %v694_v21  ;;  %v697_v32 = vmul.f32 -1.442695, %v755_v24 }
 0x269   : > { %v455_v25 = vpop.f32.mrf.mxu1 }
 0x26a   : > { %v696_v27 = vmul.f32 -1.442695, %v455_v25 }
 0x26b   : > { %v812_v29 = vpop.eup %811 }
 0x26c   : > { %v489_v30 = vadd.f32 1.0, %v812_v29  ;;  %823 = vpow2.f32 %v696_v27 }
 0x26d   : > { %v814_v31 = vpop.eup %813 }
 0x26e   : > { %825 = vrcp.f32 %v489_v30  ;;  %v488_v33 = vadd.f32 1.0, %v814_v31 }
 0x26f   : > { %v816_v34 = vpop.eup %815 }
 0x270   : > { %827 = vrcp.f32 %v488_v33  ;;  %v491_v35 = vadd.f32 1.0, %v816_v34 }
 0x271   : > { %v818_v36 = vpop.eup %817  ;;  %829 = vpow2.f32 %v697_v32 }
 0x272   : > { %831 = vrcp.f32 %v491_v35  ;;  %v490_v37 = vadd.f32 1.0, %v818_v36 }
 0x273   : > { %v820_v38 = vpop.eup %819 }
 0x274   : > { %v493_v39 = vadd.f32 1.0, %v820_v38  ;;  %833 = vrcp.f32 %v490_v37 }
 0x275   : > { %v822_v40 = vpop.eup %821 }
 0x276   : > { %835 = vrcp.f32 %v493_v39  ;;  %v492_v42 = vadd.f32 1.0, %v822_v40 }
 0x278   : > { %837 = vrcp.f32 %v492_v42 }
 0x279   : > { %v824_v41 = vpop.eup %823 }
 0x27a   : > { %v494_v46 = vadd.f32 1.0, %v824_v41 }
 0x27b   : > { %v826_v43 = vpop.eup %825 }
 0x27c   : > { %519 = vperm.xlu1 %810, %v826_v43   ;;  %839 = vrcp.f32 %v494_v46 }
 0x27d   : > { %v828_v44 = vpop.eup %827 }
 0x27e   : > { %v830_v45 = vpop.eup %829  ;;  %514 = vperm.xlu0 %809, %v828_v44  }
 0x27f   : > { %v832_v47 = vpop.eup %831  ;;  %v495_v48 = vadd.f32 1.0, %v830_v45 }
 0x280   : > { %529 = vperm.xlu1 %810, %v832_v47  }
 0x281   : > { %v834_v49 = vpop.eup %833  ;;  %841 = vrcp.f32 %v495_v48 }
 0x283   : > { %v836_v50 = vpop.eup %835 }
 0x284   : > { %524 = vperm.xlu1 %810, %v834_v49  }
 0x285   : > { %v838_v51 = vpop.eup %837 }
 0x288   : > { %539 = vperm.xlu1 %810, %v836_v50  }
 0x289   : > { %v840_v52 = vpop.eup %839 }
 0x28c   : > { %534 = vperm.xlu1 %810, %v838_v51  }
 0x28e   : > { %v842_v53 = vpop.eup %841 }
 0x290   : > { %544 = vperm.xlu1 %810, %v840_v52  }
 0x294   : > { %549 = vperm.xlu1 %810, %v842_v53  }
 0x2f7   : > { %v520_v54 = vpop.permute.xlu1 %519 }
 0x2f8   : > { %v554_v55 = vmul.f32 %v520_v54, %v1136_v26  ;;  %v555_v56 = vmul.f32 %v520_v54, %v1128_v22 }
 0x2f9   : > { %v515_v57 = vpop.permute.xlu0 %514 }
 0x2fa   : > { %570 = vst [vmem:[%s1186_s6 + $0x10] sm:$0xff] %v554_v55  ;;  %571 = vst.msk [vmem:[%s1186_s6 + $0x18] sm:$0xff] %vm205_vm0, %v555_v56  ;;  %v552_v58 = vmul.f32 %v515_v57, %v1141_v28  ;;  %v553_v26 = vmul.f32 %v515_v57, %v1131_v23 }
 0x2fb   : > { %v530_v22 = vpop.permute.xlu1 %529 }
 0x2fc   : > { %568 = vst [vmem:[%s1186_s6] sm:$0xff] %v552_v58  ;;  %569 = vst.msk [vmem:[%s1186_s6 + $0x8] sm:$0xff] %vm205_vm0, %v553_v26  ;;  %v558_v59 = vmul.f32 %v530_v22, %v1118_v18  ;;  %v559_v60 = vmul.f32 %v530_v22, %v1110_v14 }
 0x2fe   : > { %574 = vst [vmem:[%s1186_s6 + $0x30] sm:$0xff] %v558_v59  ;;  %575 = vst.msk [vmem:[%s1186_s6 + $0x38] sm:$0xff] %vm205_vm0, %v559_v60 }
 0x2ff   : > { %v525_v61 = vpop.permute.xlu1 %524 }
 0x300   : > { %v556_v28 = vmul.f32 %v525_v61, %v1123_v20  ;;  %v557_v23 = vmul.f32 %v525_v61, %v1113_v15 }
 0x302   : > { %572 = vst [vmem:[%s1186_s6 + $0x20] sm:$0xff] %v556_v28  ;;  %573 = vst.msk [vmem:[%s1186_s6 + $0x28] sm:$0xff] %vm205_vm0, %v557_v23 }
 0x303   : > { %v540_v62 = vpop.permute.xlu1 %539 }
 0x304   : > { %v562_v14 = vmul.f32 %v540_v62, %v1090_v5  ;;  %v563_v18 = vmul.f32 %v540_v62, %v1093_v6 }
 0x306   : > { %578 = vst [vmem:[%s1186_s6 + $0x50] sm:$0xff] %v562_v14  ;;  %579 = vst.msk [vmem:[%s1186_s6 + $0x58] sm:$0xff] %vm205_vm0, %v563_v18 }
 0x307   : > { %v535_v63 = vpop.permute.xlu1 %534 }
 0x308   : > { %v560_v20 = vmul.f32 %v535_v63, %v1101_v10  ;;  %v561_v15 = vmul.f32 %v535_v63, %v1104_v11 }
 0x30a   : > { %576 = vst [vmem:[%s1186_s6 + $0x40] sm:$0xff] %v560_v20  ;;  %577 = vst.msk [vmem:[%s1186_s6 + $0x48] sm:$0xff] %vm205_vm0, %v561_v15 }
 0x30b   : > { %v545_v3 = vpop.permute.xlu1 %544 }
 0x30c   : > { %v564_v7 = vmul.f32 %v545_v3, %v1082_v2  ;;  %v565_v5 = vmul.f32 %v545_v3, %v1087_v4 }
 0x30e   : > { %580 = vst [vmem:[%s1186_s6 + $0x60] sm:$0xff] %v564_v7  ;;  %581 = vst.msk [vmem:[%s1186_s6 + $0x68] sm:$0xff] %vm205_vm0, %v565_v5 }
 0x30f   : > { %v550_v6 = vpop.permute.xlu1 %549 }
 0x310   : > { %v566_v2 = vmul.f32 %v550_v6, %v1076_v0  ;;  %v567_v4 = vmul.f32 %v550_v6, %v1079_v1 }
 0x312   : > { %582 = vst [vmem:[%s1186_s6 + $0x70] sm:$0xff] %v566_v2  ;;  %583 = vst.msk [vmem:[%s1186_s6 + $0x78] sm:$0xff] %vm205_vm0, %v567_v4 }
 0x313   : > { %884 = shalt.err (!%p881_p10)
}
 0x314   : > { %s885_s28 = scalar_lea.hbm %s1226_s19, 2048  ;;  %s889_s10 = scalar_lea.hbm %s1279_s3, 4096 }
 0x315   : > { %p886_p0 = scmp.ne.s32.totalorder %s1226_s19, %s885_s28  ;;  %p890_p1 = scmp.lt.s32.totalorder %s1226_s19, %s1279_s3 }
 0x316   : > { %p891_p3 = scmp.lt.s32.totalorder %s889_s10, %s885_s28 }
 0x317   : > { %p887_p2 = pnand %p886_p0, %p1288_p12 }
 0x318   : > { %p892_p6 = por %p891_p3, %p890_p1 }
 0x319   : > { %p888_p9 = pneg %p887_p2 }
 0x31b   : > { %p893_p11 = pnand %p892_p6, %p888_p9 }
 0x31d   : > { %896 = shalt.err (!%p893_p11)
}
 0x31e   : > { %s944_s4 = smov 256   ;;  %s945_s6 = smov 16  }
 0x31f   : > { %758 = dma.vmem_to_hbm [thread:$0]  (%p1288_p12), %s1228_s7, 2048, %s1226_s19, %s585_s16, %s944_s4, %s944_s4, %s945_s6  }
 0x320 PF: > { %s613_s9 = sand.u32 1, %s923_s12   ;;  %p1289_p13 = scmp.ne.s32.totalorder %s1285_s25, 0 }
 0x321   : > { %p1290_p4 = scmp.ge.s32.totalorder %s935_s15, 2  ;;  %s614_s8 = scalar_lea.sflag [#allocation4], %s613_s9 }
 0x323   : > { %p765_p5 = pnand %p1290_p4, %p1289_p13 }
 0x325   : > { %p766_p7 = pneg %p765_p5 }
 0x327   : > { %918 = dma.done.wait (%p766_p7), %s614_s8, 2048  }
 0x328   : > { %920 = vsyncadd (%p766_p7), %s614_s8, 4294965248  ;;  %p16_p8 = scmp.ge.s32.totalorder %s991_s18, 4   ;;  %s1291_s12 = smov %s927_s13 }
 0x329   : > { %s1292_s13 = smov %s931_s14  ;;  %s1293_s14 = smov %s1003_s21 }
 0x32a   : > { %s1294_s15 = smov %s991_s18  ;;  %18 = sbr.rel (!%p16_p8) target bundleno = 5 (0x5), region = 77 }
 0x32f   :  { %619 = vsyncpa [#allocation3], 1 }
 0x330   :  { %621 = vsyncpa [#allocation3 + $0x1], 1 }
 0x331   :  { %622 = vsyncpa [#allocation4], 1 }
 0x332   :  { %624 = vsyncpa [#allocation4 + $0x1], 1 }

</bundles_post_ra>
